<compile_context>
chip_gen: v7x
topology: tpu7x:2x2x1
jax: 0.10.0
libtpu: 0.0.40
codegen_flags: <defaults>
</compile_context>

<pallas_src>
import functools
import math

import jax
import jax.numpy as jnp
from jax.experimental import pallas as pl
from jax.experimental.pallas import tpu as pltpu

LOG_STD_MAX = 2.0
LOG_STD_MIN = -20.0

_LANE = 128


def _round_up(x: int, m: int) -> int:
    return ((x + m - 1) // m) * m


def _pad_mat(w: jax.Array, mult: int = _LANE) -> jax.Array:
    fi, fo = w.shape
    return jnp.pad(w, ((0, _round_up(fi, mult) - fi), (0, _round_up(fo, mult) - fo)))


def _pad_mat_out_only(w: jax.Array, mult: int = _LANE) -> jax.Array:
    fo = w.shape[1]
    return jnp.pad(w, ((0, 0), (0, _round_up(fo, mult) - fo)))


def _pad_bias(b: jax.Array, mult: int = _LANE) -> jax.Array:
    fo = b.shape[0]
    return jnp.pad(b, (0, _round_up(fo, mult) - fo)).reshape(1, -1)


def _make_actor_kernel(n_layers: int, act_dim: int, a_pad: int, activation: str,
                       deterministic: bool, with_logprob: bool):
    """Build the fused actor kernel.

    Ref layout (inputs then outputs):
      obs, (w0, b0, ..., w_{n-1}, b_{n-1}), w_head, b_head, [noise],
      pi_out, [logp_out]
    noise is present only when not deterministic; logp_out only when with_logprob.
    """
    log2 = math.log(2.0)
    half_log_2pi = 0.5 * math.log(2.0 * math.pi)

    def _act(h):
        if activation == "relu":
            return jnp.maximum(h, 0.0)
        return jnp.tanh(h)  # "tanh"

    def _log1p(t):
        # Kahan-style log1p using only primitives guaranteed to lower on Mosaic
        # (log, div, where).  Accurate for tiny t, unlike log(1 + t).
        u = 1.0 + t
        return jnp.where(u == 1.0, t, jnp.log(u) * (t / (u - 1.0)))

    def kernel(*refs):
        idx = 0
        obs_ref = refs[idx]; idx += 1
        layer_refs = refs[idx:idx + 2 * n_layers]; idx += 2 * n_layers
        wh_ref = refs[idx]; idx += 1
        bh_ref = refs[idx]; idx += 1
        noise_ref = None
        if not deterministic:
            noise_ref = refs[idx]; idx += 1
        pi_ref = refs[idx]; idx += 1
        logp_ref = refs[idx] if with_logprob else None

        # MLP trunk: activation after every layer (output_activation == activation).
        h = obs_ref[...]
        for i in range(n_layers):
            w = layer_refs[2 * i][...]
            b = layer_refs[2 * i + 1][...]
            h = _act(jnp.dot(h, w, preferred_element_type=jnp.float32) + b)

        # Fused heads: one (bt, h_pad) x (h_pad, 2*a_pad) matmul; split at the
        # 128-lane vreg boundary (free).
        head = jnp.dot(h, wh_ref[...], preferred_element_type=jnp.float32) + bh_ref[...]
        mu = head[:, :a_pad]
        log_std = jnp.clip(head[:, a_pad:], LOG_STD_MIN, LOG_STD_MAX)
        std = jnp.exp(log_std)

        if deterministic:
            pre = mu
        else:
            eps = noise_ref[...]
            pre = mu + std * eps

        if with_logprob:
            # z = (pre - mu)/std is `eps` by construction (0 when deterministic),
            # so no divide is needed.
            if deterministic:
                log_prob = -log_std - half_log_2pi
            else:
                log_prob = -0.5 * eps * eps - log_std - half_log_2pi
            # tanh correction: 2*(log 2 - x - softplus(-2x)), stable softplus.
            neg2x = -2.0 * pre
            softplus = jnp.maximum(neg2x, 0.0) + _log1p(jnp.exp(-jnp.abs(neg2x)))
            lp = log_prob - 2.0 * (log2 - pre - softplus)
            # Mask out the zero-padded action columns before reducing (padded
            # head weight/bias columns are exactly zero by construction).
            col = jax.lax.broadcasted_iota(jnp.int32, lp.shape, 1)
            lp = jnp.where(col < act_dim, lp, 0.0)
            logp = jnp.sum(lp, axis=-1, keepdims=True)
            # TODO(synk): for very large batches the logp result could be packed
            # lane-major instead of broadcast to 128 lanes; low priority here.
            logp_ref[...] = jnp.broadcast_to(logp, logp_ref.shape)

        pi_ref[...] = jnp.tanh(pre)

    return kernel


@functools.partial(
    jax.jit,
    static_argnames=("act_dim", "activation", "deterministic", "with_logprob"))
def _actor_forward(obs, net_params, head_w, head_b, noise, *, act_dim, activation,
                   deterministic, with_logprob):
    B, obs_dim = obs.shape
    a_pad = head_w.shape[1] // 2
    n_layers = len(net_params)

    # Batch tile: sublane-aligned, capped at 1024 rows; sized so large batches
    # give >= 2 grid steps (lets the "parallel" axis shard across v7x's two TCs).
    bt = min(_round_up(max(pl.cdiv(B, 2), 1), 8), 1024)
    b_pad = _round_up(B, bt)

    obs_p = jnp.pad(obs.astype(jnp.float32), ((0, b_pad - B), (0, 0)))

    kernel = _make_actor_kernel(n_layers, act_dim, a_pad, activation,
                                deterministic, with_logprob)

    inputs = [obs_p]
    in_specs = [pl.BlockSpec((bt, obs_dim), lambda i: (i, 0))]
    for (w, b) in net_params:
        inputs += [w, b]
        in_specs += [pl.BlockSpec(w.shape, lambda i: (0, 0)),
                     pl.BlockSpec(b.shape, lambda i: (0, 0))]
    inputs += [head_w, head_b]
    in_specs += [pl.BlockSpec(head_w.shape, lambda i: (0, 0)),
                 pl.BlockSpec(head_b.shape, lambda i: (0, 0))]
    if not deterministic:
        noise_p = jnp.pad(noise.astype(jnp.float32),
                          ((0, b_pad - B), (0, a_pad - act_dim)))
        inputs.append(noise_p)
        in_specs.append(pl.BlockSpec((bt, a_pad), lambda i: (i, 0)))

    out_shape = [jax.ShapeDtypeStruct((b_pad, a_pad), jnp.float32)]
    out_specs = [pl.BlockSpec((bt, a_pad), lambda i: (i, 0))]
    if with_logprob:
        out_shape.append(jax.ShapeDtypeStruct((b_pad, _LANE), jnp.float32))
        out_specs.append(pl.BlockSpec((bt, _LANE), lambda i: (i, 0)))

    outs = pl.pallas_call(
        kernel,
        out_shape=tuple(out_shape),
        grid=(b_pad // bt,),
        in_specs=in_specs,
        out_specs=tuple(out_specs),
        compiler_params=pltpu.CompilerParams(dimension_semantics=("parallel",)),
    )(*inputs)

    pi = outs[0][:B, :act_dim]
    logp = outs[1][:B, 0] if with_logprob else None
    return pi, logp


class NBHSquashedGaussianMLPActorPallas:
    """JAX/Pallas re-implementation of osrl.common.net.NBHSquashedGaussianMLPActor."""

    def __init__(self, obs_dim, act_dim, num_heads, hidden_sizes,
                 activation: str = "relu", key=None):
        hidden_sizes = [int(s) for s in hidden_sizes]
        if len(hidden_sizes) < 1:
            raise ValueError("need at least one hidden layer")
        if activation not in ("relu", "tanh"):
            raise ValueError("supported activations: relu, tanh")
        self.obs_dim = int(obs_dim)
        self.act_dim = int(act_dim)
        self.num_heads = int(num_heads)
        self.activation = activation
        if key is None:
            key = jax.random.PRNGKey(0)

        def init_linear(k, fan_in, fan_out):
            # torch.nn.Linear default init: U(-1/sqrt(fan_in), 1/sqrt(fan_in)).
            kw, kb = jax.random.split(k)
            bound = 1.0 / math.sqrt(fan_in)
            w = jax.random.uniform(kw, (fan_in, fan_out), jnp.float32, -bound, bound)
            b = jax.random.uniform(kb, (fan_out,), jnp.float32, -bound, bound)
            return w, b

        sizes = [self.obs_dim] + hidden_sizes
        self.net_params = []          # raw (in, out) weights for the reference
        net_params_pad = []           # padded params for the kernel
        for i in range(len(sizes) - 1):
            key, sub = jax.random.split(key)
            w, b = init_linear(sub, sizes[i], sizes[i + 1])
            self.net_params.append((w, b))
            if i == 0:
                # Layer 0 keeps its true input dim (obs is passed unpadded).
                w_p = _pad_mat_out_only(w)
            else:
                w_p = _pad_mat(w)
            net_params_pad.append((w_p, _pad_bias(b)))
        self.net_params_pad = tuple(net_params_pad)

        # Heads: fuse [action-mean | log-std] into one 2*a_pad-wide weight/bias.
        self.head_params = []
        self.head_params_pad = []
        h_last = hidden_sizes[-1]
        for _ in range(self.num_heads):
            key, ka, kl = jax.random.split(key, 3)
            wa, ba = init_linear(ka, h_last, self.act_dim)
            wl, bl = init_linear(kl, h_last, self.act_dim)
            self.head_params.append((wa, ba, wl, bl))
            w_head = jnp.concatenate([_pad_mat(wa), _pad_mat(wl)], axis=1)
            b_head = jnp.concatenate([_pad_bias(ba), _pad_bias(bl)], axis=1)
            self.head_params_pad.append((w_head, b_head))

    def __call__(self, obs, headtag, deterministic=False, with_logprob=True,
                 noise=None, rng=None):
        obs = jnp.asarray(obs, jnp.float32)
        if deterministic:
            noise = None
        elif noise is None:
            if rng is None:
                raise ValueError(
                    "stochastic call requires `noise` or `rng` (no silent PRNGKey reuse)")
            noise = jax.random.normal(rng, (obs.shape[0], self.act_dim), jnp.float32)
        head_w, head_b = self.head_params_pad[headtag]
        return _actor_forward(
            obs, self.net_params_pad, head_w, head_b, noise,
            act_dim=self.act_dim, activation=self.activation,
            deterministic=bool(deterministic), with_logprob=bool(with_logprob))

    # TODO(synk): with_distribution=True (returning a Normal distribution object) has
    # no Pallas equivalent; mu/std are computed in-kernel but not returned as an object.

    def reference(self, obs, headtag, deterministic=False, with_logprob=True, noise=None):
        """Pure-JAX mirror of the torch forward, for correctness checks."""
        act = (lambda v: jnp.maximum(v, 0.0)) if self.activation == "relu" else jnp.tanh
        h = jnp.asarray(obs, jnp.float32)
        for (w, b) in self.net_params:
            h = act(h @ w + b)
        wa, ba, wl, bl = self.head_params[headtag]
        mu = h @ wa + ba
        log_std = jnp.clip(h @ wl + bl, LOG_STD_MIN, LOG_STD_MAX)
        std = jnp.exp(log_std)
        pre = mu if deterministic else mu + std * noise
        if with_logprob:
            logp = (-((pre - mu) ** 2) / (2.0 * std ** 2) - log_std
                    - math.log(math.sqrt(2.0 * math.pi))).sum(-1)
            logp = logp - (2.0 * (math.log(2.0) - pre - jax.nn.softplus(-2.0 * pre))).sum(-1)
        else:
            logp = None
        return jnp.tanh(pre), logp


if __name__ == "__main__":
    key = jax.random.PRNGKey(0)
    k_obs, k_param, k_noise = jax.random.split(key, 3)

    obs_dim, act_dim, num_heads = 17, 6, 2
    hidden_sizes = [64, 64]
    batch = 4

    obs = jax.random.normal(k_obs, (batch, obs_dim), jnp.float32)
    actor = NBHSquashedGaussianMLPActorPallas(
        obs_dim, act_dim, num_heads, hidden_sizes, activation="relu", key=k_param)

    # 1) Deterministic path (no noise stream), head 0, with log-prob.
    pi0, lp0 = actor(obs, headtag=0, deterministic=True, with_logprob=True)
    pi0 = jax.block_until_ready(pi0)
    lp0 = jax.block_until_ready(lp0)
    pi0_ref, lp0_ref = actor.reference(obs, 0, deterministic=True, with_logprob=True)
    assert pi0.shape == (batch, act_dim)
    assert lp0.shape == (batch,)
    assert jnp.allclose(pi0, pi0_ref, atol=1e-4, rtol=1e-4)
    assert jnp.allclose(lp0, lp0_ref, atol=5e-4, rtol=5e-4)

    # 2) Stochastic (reparameterized) path with explicit noise, head 1, with log-prob.
    noise = jax.random.normal(k_noise, (batch, act_dim), jnp.float32)
    pi1, lp1 = actor(obs, headtag=1, deterministic=False, with_logprob=True, noise=noise)
    pi1 = jax.block_until_ready(pi1)
    lp1 = jax.block_until_ready(lp1)
    pi1_ref, lp1_ref = actor.reference(obs, 1, deterministic=False,
                                       with_logprob=True, noise=noise)
    assert pi1.shape == (batch, act_dim)
    assert lp1.shape == (batch,)
    assert jnp.allclose(pi1, pi1_ref, atol=1e-4, rtol=1e-4)
    assert jnp.allclose(lp1, lp1_ref, atol=5e-4, rtol=5e-4)

    # 3) Stochastic path without log-prob (no logp output stream).
    pi2, lp2 = actor(obs, headtag=0, deterministic=False, with_logprob=False, noise=noise)
    pi2 = jax.block_until_ready(pi2)
    pi2_ref, _ = actor.reference(obs, 0, deterministic=False, with_logprob=False, noise=noise)
    assert lp2 is None
    assert jnp.allclose(pi2, pi2_ref, atol=1e-4, rtol=1e-4)

    print("KERNEL_OK")
</pallas_src>

<mosaic_0001>
module attributes {stable_mosaic.version = 11 : i64} {
  func.func @kernel(%arg0: i32, %arg1: memref<8x17xf32, #tpu.memory_space<vmem>>, %arg2: memref<17x128xf32, #tpu.memory_space<vmem>>, %arg3: memref<1x128xf32, #tpu.memory_space<vmem>>, %arg4: memref<128x128xf32, #tpu.memory_space<vmem>>, %arg5: memref<1x128xf32, #tpu.memory_space<vmem>>, %arg6: memref<128x256xf32, #tpu.memory_space<vmem>>, %arg7: memref<1x256xf32, #tpu.memory_space<vmem>>, %arg8: memref<8x128xf32, #tpu.memory_space<vmem>>, %arg9: memref<8x128xf32, #tpu.memory_space<vmem>>) attributes {dimension_semantics = [#tpu.dimension_semantics<parallel>], iteration_bounds = array<i64: 1>, scalar_prefetch = 0 : i64, scratch_operands = 0 : i64, tpu.core_type = #tpu.core_type<tc>, window_params = [{transform_indices = @transform_0, window_bounds = array<i64: 8, 17>}, {pipeline_mode = #tpu.pipeline_mode<synchronous>, transform_indices = @transform_1, window_bounds = array<i64: 17, 128>}, {pipeline_mode = #tpu.pipeline_mode<synchronous>, transform_indices = @transform_2, window_bounds = array<i64: 1, 128>}, {pipeline_mode = #tpu.pipeline_mode<synchronous>, transform_indices = @transform_3, window_bounds = array<i64: 128, 128>}, {pipeline_mode = #tpu.pipeline_mode<synchronous>, transform_indices = @transform_4, window_bounds = array<i64: 1, 128>}, {pipeline_mode = #tpu.pipeline_mode<synchronous>, transform_indices = @transform_5, window_bounds = array<i64: 128, 256>}, {pipeline_mode = #tpu.pipeline_mode<synchronous>, transform_indices = @transform_6, window_bounds = array<i64: 1, 256>}, {transform_indices = @transform_7, window_bounds = array<i64: 8, 128>}, {transform_indices = @transform_8, window_bounds = array<i64: 8, 128>}]} {
    %c0 = arith.constant 0 : index
    %c0_0 = arith.constant 0 : index
    %0 = vector.load %arg1[%c0, %c0_0] : memref<8x17xf32, #tpu.memory_space<vmem>>, vector<8x17xf32>
    %c0_1 = arith.constant 0 : index
    %c0_2 = arith.constant 0 : index
    %1 = vector.load %arg2[%c0_1, %c0_2] : memref<17x128xf32, #tpu.memory_space<vmem>>, vector<17x128xf32>
    %c0_3 = arith.constant 0 : index
    %c0_4 = arith.constant 0 : index
    %2 = vector.load %arg3[%c0_3, %c0_4] : memref<1x128xf32, #tpu.memory_space<vmem>>, vector<1x128xf32>
    %cst = arith.constant dense<0.000000e+00> : vector<8x128xf32>
    %3 = tpu.matmul %0, %1, %cst {dimension_numbers = #tpu.dot_dimension_numbers<[1], [0], [0], [1], [0, 0, 1, 1], [], []>} : vector<8x17xf32>, vector<17x128xf32>, vector<8x128xf32> -> vector<8x128xf32>
    %4 = vector.broadcast %2 : vector<1x128xf32> to vector<8x128xf32>
    %5 = arith.addf %3, %4 : vector<8x128xf32>
    %cst_5 = arith.constant 0.000000e+00 : f32
    %6 = vector.broadcast %cst_5 : f32 to vector<8x128xf32>
    %7 = arith.maximumf %5, %6 : vector<8x128xf32>
    %c0_6 = arith.constant 0 : index
    %c0_7 = arith.constant 0 : index
    %8 = vector.load %arg4[%c0_6, %c0_7] : memref<128x128xf32, #tpu.memory_space<vmem>>, vector<128x128xf32>
    %c0_8 = arith.constant 0 : index
    %c0_9 = arith.constant 0 : index
    %9 = vector.load %arg5[%c0_8, %c0_9] : memref<1x128xf32, #tpu.memory_space<vmem>>, vector<1x128xf32>
    %cst_10 = arith.constant dense<0.000000e+00> : vector<8x128xf32>
    %10 = tpu.matmul %7, %8, %cst_10 {dimension_numbers = #tpu.dot_dimension_numbers<[1], [0], [0], [1], [0, 0, 1, 1], [], []>} : vector<8x128xf32>, vector<128x128xf32>, vector<8x128xf32> -> vector<8x128xf32>
    %11 = vector.broadcast %9 : vector<1x128xf32> to vector<8x128xf32>
    %12 = arith.addf %10, %11 : vector<8x128xf32>
    %cst_11 = arith.constant 0.000000e+00 : f32
    %13 = vector.broadcast %cst_11 : f32 to vector<8x128xf32>
    %14 = arith.maximumf %12, %13 : vector<8x128xf32>
    %c0_12 = arith.constant 0 : index
    %c0_13 = arith.constant 0 : index
    %15 = vector.load %arg6[%c0_12, %c0_13] : memref<128x256xf32, #tpu.memory_space<vmem>>, vector<128x256xf32>
    %cst_14 = arith.constant dense<0.000000e+00> : vector<8x256xf32>
    %16 = tpu.matmul %14, %15, %cst_14 {dimension_numbers = #tpu.dot_dimension_numbers<[1], [0], [0], [1], [0, 0, 1, 1], [], []>} : vector<8x128xf32>, vector<128x256xf32>, vector<8x256xf32> -> vector<8x256xf32>
    %c0_15 = arith.constant 0 : index
    %c0_16 = arith.constant 0 : index
    %17 = vector.load %arg7[%c0_15, %c0_16] : memref<1x256xf32, #tpu.memory_space<vmem>>, vector<1x256xf32>
    %18 = vector.broadcast %17 : vector<1x256xf32> to vector<8x256xf32>
    %19 = arith.addf %16, %18 : vector<8x256xf32>
    %20 = vector.extract_strided_slice %19 {offsets = [0, 0], sizes = [8, 128], strides = [1, 1]} : vector<8x256xf32> to vector<8x128xf32>
    %21 = vector.extract_strided_slice %19 {offsets = [0, 128], sizes = [8, 128], strides = [1, 1]} : vector<8x256xf32> to vector<8x128xf32>
    %cst_17 = arith.constant -2.000000e+01 : f32
    %cst_18 = arith.constant 2.000000e+00 : f32
    %22 = vector.broadcast %cst_17 : f32 to vector<8x128xf32>
    %23 = arith.maximumf %22, %21 : vector<8x128xf32>
    %24 = vector.broadcast %cst_18 : f32 to vector<8x128xf32>
    %25 = arith.minimumf %24, %23 : vector<8x128xf32>
    %cst_19 = arith.constant 0.000000e+00 : f32
    %26 = vector.broadcast %cst_19 : f32 to vector<8x128xf32>
    %27 = arith.subf %26, %25 : vector<8x128xf32>
    %cst_20 = arith.constant 0.918938517 : f32
    %28 = vector.broadcast %cst_20 : f32 to vector<8x128xf32>
    %29 = arith.subf %27, %28 : vector<8x128xf32>
    %cst_21 = arith.constant -2.000000e+00 : f32
    %30 = vector.broadcast %cst_21 : f32 to vector<8x128xf32>
    %31 = arith.mulf %30, %20 : vector<8x128xf32>
    %cst_22 = arith.constant 0.000000e+00 : f32
    %32 = vector.broadcast %cst_22 : f32 to vector<8x128xf32>
    %33 = arith.maximumf %31, %32 : vector<8x128xf32>
    %34 = math.absf %31 : vector<8x128xf32>
    %cst_23 = arith.constant 0.000000e+00 : f32
    %35 = vector.broadcast %cst_23 : f32 to vector<8x128xf32>
    %36 = arith.subf %35, %34 : vector<8x128xf32>
    %37 = math.exp %36 : vector<8x128xf32>
    %cst_24 = arith.constant 1.000000e+00 : f32
    %38 = vector.broadcast %cst_24 : f32 to vector<8x128xf32>
    %39 = arith.addf %38, %37 : vector<8x128xf32>
    %cst_25 = arith.constant 1.000000e+00 : f32
    %40 = vector.broadcast %cst_25 : f32 to vector<8x128xf32>
    %41 = arith.cmpf oeq, %39, %40 : vector<8x128xf32>
    %42 = math.log %39 : vector<8x128xf32>
    %cst_26 = arith.constant 1.000000e+00 : f32
    %43 = vector.broadcast %cst_26 : f32 to vector<8x128xf32>
    %44 = arith.subf %39, %43 : vector<8x128xf32>
    %45 = arith.divf %37, %44 : vector<8x128xf32>
    %46 = arith.mulf %42, %45 : vector<8x128xf32>
    %47 = arith.select %41, %37, %46 : vector<8x128xi1>, vector<8x128xf32>
    %48 = arith.addf %33, %47 : vector<8x128xf32>
    %cst_27 = arith.constant 0.693147182 : f32
    %49 = vector.broadcast %cst_27 : f32 to vector<8x128xf32>
    %50 = arith.subf %49, %20 : vector<8x128xf32>
    %51 = arith.subf %50, %48 : vector<8x128xf32>
    %cst_28 = arith.constant 2.000000e+00 : f32
    %52 = vector.broadcast %cst_28 : f32 to vector<8x128xf32>
    %53 = arith.mulf %52, %51 : vector<8x128xf32>
    %54 = arith.subf %29, %53 : vector<8x128xf32>
    %55 = tpu.iota {dimensions = array<i32: 1>} : vector<8x128xi32>
    %c6_i32 = arith.constant 6 : i32
    %56 = vector.broadcast %c6_i32 : i32 to vector<8x128xi32>
    %57 = arith.cmpi slt, %55, %56 : vector<8x128xi32>
    %cst_29 = arith.constant 0.000000e+00 : f32
    %58 = vector.broadcast %cst_29 : f32 to vector<8x128xf32>
    %59 = arith.select %57, %54, %58 : vector<8x128xi1>, vector<8x128xf32>
    %cst_30 = arith.constant dense<0.000000e+00> : vector<8xf32>
    %60 = vector.multi_reduction <add>, %59, %cst_30 [1] : vector<8x128xf32> to vector<8xf32>
    %61 = vector.shape_cast %60 : vector<8xf32> to vector<8x1xf32>
    %62 = vector.shape_cast %61 : vector<8x1xf32> to vector<8x1xf32>
    %63 = vector.broadcast %62 : vector<8x1xf32> to vector<8x128xf32>
    %c0_31 = arith.constant 0 : index
    %c0_32 = arith.constant 0 : index
    %64 = vector.load %arg9[%c0_31, %c0_32] : memref<8x128xf32, #tpu.memory_space<vmem>>, vector<8x128xf32>
    tpu.vector_store %arg9[%c0_31, %c0_32], %63 {strides = array<i32>} : memref<8x128xf32, #tpu.memory_space<vmem>>, vector<8x128xf32>,
    %65 = math.tanh %20 : vector<8x128xf32>
    %c0_33 = arith.constant 0 : index
    %c0_34 = arith.constant 0 : index
    %66 = vector.load %arg8[%c0_33, %c0_34] : memref<8x128xf32, #tpu.memory_space<vmem>>, vector<8x128xf32>
    tpu.vector_store %arg8[%c0_33, %c0_34], %65 {strides = array<i32>} : memref<8x128xf32, #tpu.memory_space<vmem>>, vector<8x128xf32>,
    return
  }
  func.func @transform_0(%arg0: i32) -> (i32, i32) {
    %c0_i32 = arith.constant 0 : i32
    %c0_i32_0 = arith.constant 0 : i32
    return %arg0, %c0_i32 : i32, i32
  }
  func.func @transform_1(%arg0: i32) -> (i32, i32) {
    %c0_i32 = arith.constant 0 : i32
    %c0_i32_0 = arith.constant 0 : i32
    %c0_i32_1 = arith.constant 0 : i32
    return %c0_i32, %c0_i32_0 : i32, i32
  }
  func.func @transform_2(%arg0: i32) -> (i32, i32) {
    %c0_i32 = arith.constant 0 : i32
    %c0_i32_0 = arith.constant 0 : i32
    %c0_i32_1 = arith.constant 0 : i32
    return %c0_i32, %c0_i32_0 : i32, i32
  }
  func.func @transform_3(%arg0: i32) -> (i32, i32) {
    %c0_i32 = arith.constant 0 : i32
    %c0_i32_0 = arith.constant 0 : i32
    %c0_i32_1 = arith.constant 0 : i32
    return %c0_i32, %c0_i32_0 : i32, i32
  }
  func.func @transform_4(%arg0: i32) -> (i32, i32) {
    %c0_i32 = arith.constant 0 : i32
    %c0_i32_0 = arith.constant 0 : i32
    %c0_i32_1 = arith.constant 0 : i32
    return %c0_i32, %c0_i32_0 : i32, i32
  }
  func.func @transform_5(%arg0: i32) -> (i32, i32) {
    %c0_i32 = arith.constant 0 : i32
    %c0_i32_0 = arith.constant 0 : i32
    %c0_i32_1 = arith.constant 0 : i32
    return %c0_i32, %c0_i32_0 : i32, i32
  }
  func.func @transform_6(%arg0: i32) -> (i32, i32) {
    %c0_i32 = arith.constant 0 : i32
    %c0_i32_0 = arith.constant 0 : i32
    %c0_i32_1 = arith.constant 0 : i32
    return %c0_i32, %c0_i32_0 : i32, i32
  }
  func.func @transform_7(%arg0: i32) -> (i32, i32) {
    %c0_i32 = arith.constant 0 : i32
    %c0_i32_0 = arith.constant 0 : i32
    return %arg0, %c0_i32 : i32, i32
  }
  func.func @transform_8(%arg0: i32) -> (i32, i32) {
    %c0_i32 = arith.constant 0 : i32
    %c0_i32_0 = arith.constant 0 : i32
    return %arg0, %c0_i32 : i32, i32
  }
}

</mosaic_0001>

<bundles_post_ra>
// kernel: _actor_forward.1
= control target key start
LH: loop header
LB: loop body
LE: loop exit
PB: predicated region body
PF: predicated region fallthrough
CT: control target
= control target key end

     0   :  { %14 = vsyncpa [#allocation3], 0  ;;  %s745_s0 = inlined_call_operand.vmem [shape: f32[8,17], index: 0, kind: input, shape index: {}]   ;;  %s746_s1 = inlined_call_operand.hbm [shape: f32[17,128], index: 1, kind: input, shape index: {}]   ;;  %s747_s2 = inlined_call_operand.vmem [shape: f32[1,128], index: 2, kind: input, shape index: {}]   ;;  %s748_s3 = inlined_call_operand.hbm [shape: f32[128,128], index: 3, kind: input, shape index: {}]   ;;  %s749_s4 = inlined_call_operand.vmem [shape: f32[1,128], index: 4, kind: input, shape index: {}]   ;;  %s750_s5 = inlined_call_operand.hbm [shape: f32[128,256], index: 5, kind: input, shape index: {}]   ;;  %s751_s6 = inlined_call_operand.vmem [shape: f32[1,256], index: 6, kind: input, shape index: {}]   ;;  %s752_s7 = inlined_call_operand.vmem [shape: f32[8,128], index: 7, kind: output, shape index: {0}]   ;;  %s753_s8 = inlined_call_operand.vmem [shape: f32[8,128], index: 8, kind: output, shape index: {1}]  }
   0x1   :  { %15 = vsyncpa [#allocation5], 0  ;;  %s629_s27 = smov [#allocation4]   ;;  %s630_s29 = smov [#allocation2]  }
   0x2   :  { %s37_s28 = sshll.u32 %s629_s27, 4  ;;  %s23_s30 = sshll.u32 %s630_s29, 4  ;;  %s38_s28 = int_to_ptr.vmem [resolvable:$true] %s37_s28  ;;  %s684_s30 = int_to_ptr.vmem [resolvable:$true] %s23_s30 }
   0x3   :  { %s559_s11 = scalar_lea.hbm %s748_s3, 2048 }
   0x4   :  { %p560_p0 = scmp.ne.s32.totalorder %s748_s3, %s559_s11  ;;  %p563_p1 = scmp.lt.u32.totalorder %s559_s11, %s748_s3 }
   0x6   :  { %p565_p2 = pnand %p563_p1, %p560_p0 }
   0x8   :  { %568 = shalt.err (!%p565_p2)
}
   0x9   :  { %s569_s16 = scalar_lea.vmem %s38_s28, 2048  ;;  %p574_p4 = scmp.lt.s32.totalorder %s38_s28, %s38_s28 }
   0xa   :  { %p570_p3 = scmp.ne.s32.totalorder %s38_s28, %s569_s16  ;;  %p575_p5 = scmp.lt.s32.totalorder %s569_s16, %s569_s16 }
   0xc   :  { %p576_p6 = por %p575_p5, %p574_p4 }
   0xe   :  { %p577_p7 = pnand %p576_p6, %p570_p3 }
  0x10   :  { %580 = shalt.err (!%p577_p7)
}
  0x11   :  { %s631_s17 = smov 128   ;;  %s632_s18 = smov 8  }
  0x12   :  { %43 = dma.hbm_to_vmem [thread:$0]  %s748_s3, 2048, %s38_s28, [#allocation5], %s631_s17, %s631_s17, %s632_s18  }
  0x13   :  { %s581_s23 = scalar_lea.hbm %s746_s1, 384 }
  0x14   :  { %p582_p8 = scmp.ne.s32.totalorder %s746_s1, %s581_s23  ;;  %p585_p9 = scmp.lt.u32.totalorder %s581_s23, %s746_s1 }
  0x16   :  { %p587_p10 = pnand %p585_p9, %p582_p8 }
  0x18   :  { %590 = shalt.err (!%p587_p10)
}
  0x19   :  { %s591_s29 = scalar_lea.vmem %s684_s30, 384  ;;  %p596_p12 = scmp.lt.s32.totalorder %s684_s30, %s684_s30 }
  0x1a   :  { %p592_p11 = scmp.ne.s32.totalorder %s684_s30, %s591_s29  ;;  %p597_p13 = scmp.lt.s32.totalorder %s591_s29, %s591_s29 }
  0x1c   :  { %p598_p0 = por %p597_p13, %p596_p12 }
  0x1e   :  { %p599_p1 = pnand %p598_p0, %p592_p11 }
  0x20   :  { %602 = shalt.err (!%p599_p1)
}
  0x21   :  { %29 = dma.hbm_to_vmem [thread:$0]  %s746_s1, 384, %s684_s30, [#allocation3], %s631_s17, %s631_s17, %s632_s18  }
  0x22   :  { %s633_s9 = smov [#allocation6]   ;;  %s603_s13 = scalar_lea.hbm %s750_s5, 4096 }
  0x23   :  { %s51_s10 = sshll.u32 %s633_s9, 4  ;;  %p604_p2 = scmp.ne.s32.totalorder %s750_s5, %s603_s13  ;;  %s52_s10 = int_to_ptr.vmem [resolvable:$true] %s51_s10 }
  0x24   :  { %p607_p3 = scmp.lt.u32.totalorder %s603_s13, %s750_s5 }
  0x26   :  { %p609_p4 = pnand %p607_p3, %p604_p2 }
  0x28   :  { %612 = shalt.err (!%p609_p4)
}
  0x29   :  { %s613_s20 = scalar_lea.vmem %s52_s10, 4096  ;;  %p618_p6 = scmp.lt.s32.totalorder %s52_s10, %s52_s10 }
  0x2a   :  { %p614_p5 = scmp.ne.s32.totalorder %s52_s10, %s613_s20  ;;  %p619_p7 = scmp.lt.s32.totalorder %s613_s20, %s613_s20 }
  0x2c   :  { %p620_p8 = por %p619_p7, %p618_p6 }
  0x2e   :  { %p621_p9 = pnand %p620_p8, %p614_p5 }
  0x30   :  { %624 = shalt.err (!%p621_p9)
}
  0x31   :  { %s634_s1 = smov 256   ;;  %s635_s30 = smov 16  }
  0x32   :  { %57 = dma.hbm_to_vmem [thread:$0]  %s750_s5, 4096, %s52_s10, [#allocation5], %s634_s1, %s634_s1, %s635_s30  }
  0x33   :  { %625 = dma.done.wait [#allocation3], 384  }
  0x34   :  { %626 = vsyncadd [#allocation3], 4294966912 }
  0x35   :  { %627 = dma.done.wait [#allocation5], 6144  }
  0x36   :  { %628 = vsyncadd [#allocation5], 4294961152  ;;  %v636_v0 = vmov 0.0|0.0   ;;  %vm637_vm0 = vmmov 0   ;;  %v638_v1 = vmov 0.0   ;;  %v70_v2 = vld [vmem:[#allocation2] sm:$0xff] }
  0x37   :  { %482 = vmatprep.subr.bf16.mxu0 %v636_v0  ;;  %444 = vmatprep.mubr.msk.f32.mxu0 %vm637_vm0, %v638_v1  ;;  %v71_v3 = vld [vmem:[#allocation2 + $0x8] sm:$0xff]  ;;  %v159_v5 = vld [vmem:[#allocation4] sm:$0xff]  ;;  %v160_v6 = vld [vmem:[#allocation4 + $0x8] sm:$0xff]  ;;  %vm84_vm1 = vcmask 1040384   ;;  %vm80_vm2 = vcmask 138240  }
  0x38   :  { %485 = vmatprep.subr.bf16.mxu1 %v636_v0  ;;  %479 = vmatprep.mubr.msk.f32.mxu1 %vm637_vm0, %v638_v1  ;;  %v483_v4 = vpack.c.bf16 %v71_v3, %v70_v2  ;;  %v486_v7 = vpack.c.bf16 %v160_v6, %v159_v5  ;;  %v161_v8 = vld [vmem:[#allocation4 + $0x10] sm:$0xff]  ;;  %v162_v9 = vld [vmem:[#allocation4 + $0x18] sm:$0xff]  ;;  %v69_v12 = vld [vmem:[%s745_s0] sm:$0xff] }
  0x39   :  { %v72_v10 = vld [vmem:[#allocation2 + $0x10] sm:$0x1]  ;;  %v489_v11 = vpack.c.bf16 %v162_v9, %v161_v8  ;;  %v163_v13 = vld [vmem:[#allocation4 + $0x20] sm:$0xff]  ;;  %v164_v14 = vld [vmem:[#allocation4 + $0x28] sm:$0xff] }
  0x3a   :  { %484 = vmatpush3.bf16.msra.mxu0 %v483_v4  ;;  %487 = vmatpush3.bf16.msra.mxu1 %v486_v7  ;;  %v492_v15 = vpack.c.bf16 %v164_v14, %v163_v13  ;;  %v165_v16 = vld [vmem:[#allocation4 + $0x30] sm:$0xff]  ;;  %v166_v17 = vld [vmem:[#allocation4 + $0x38] sm:$0xff]  ;;  %v167_v19 = vld [vmem:[#allocation4 + $0x40] sm:$0xff] }
  0x3b   :  { %442 = vmatprep.subr.mxu0 %v638_v1  ;;  %488 = vmatprep.subr.bf16.mxu1 %v636_v0  ;;  %v495_v18 = vpack.c.bf16 %v166_v17, %v165_v16  ;;  %v168_v20 = vld [vmem:[#allocation4 + $0x48] sm:$0xff]  ;;  %v169_v22 = vld [vmem:[#allocation4 + $0x50] sm:$0xff]  ;;  %v170_v23 = vld [vmem:[#allocation4 + $0x58] sm:$0xff] }
  0x3c   :  { %v498_v21 = vpack.c.bf16 %v168_v20, %v167_v19  ;;  %v501_v24 = vpack.c.bf16 %v170_v23, %v169_v22  ;;  %v171_v25 = vld [vmem:[#allocation4 + $0x60] sm:$0xff]  ;;  %v172_v26 = vld [vmem:[#allocation4 + $0x68] sm:$0xff]  ;;  %v173_v28 = vld [vmem:[#allocation4 + $0x70] sm:$0xff] }
  0x3d   :  { %v504_v27 = vpack.c.bf16 %v172_v26, %v171_v25  ;;  %v174_v29 = vld [vmem:[#allocation4 + $0x78] sm:$0xff]  ;;  %v254_v31 = vld [vmem:[#allocation6 + $0x8] sm:$0xff]  ;;  %v253_v33 = vld [vmem:[#allocation6] sm:$0xff]  ;;  %v287_v25 = vlaneseq }
  0x3e   :  { %443 = vmatpush3.msk.msra.mxu0 %vm84_vm1, %v72_v10  ;;  %490 = vmatpush3.bf16.msra.mxu1 %v489_v11  ;;  %v507_v30 = vpack.c.bf16 %v174_v29, %v173_v28  ;;  %v256_v32 = vld [vmem:[#allocation6 + $0x18] sm:$0xff]  ;;  %v255_v35 = vld [vmem:[#allocation6 + $0x10] sm:$0xff]  ;;  %v258_v36 = vld [vmem:[#allocation6 + $0x28] sm:$0xff] }
  0x3f   :  { %445 = vmatmul.mubr.msk.f32.vlgmr.msra.gmra.mrb[0].mxu0 %vm80_vm2, %v69_v12  ;;  %491 = vmatprep.subr.bf16.mxu1 %v636_v0  ;;  %v509_v34 = vpack.c.bf16 %v256_v32, %v254_v31  ;;  %v260_v37 = vld [vmem:[#allocation6 + $0x38] sm:$0xff]  ;;  %v511_v38 = vpack.c.bf16 %v255_v35, %v253_v33  ;;  %v257_v40 = vld [vmem:[#allocation6 + $0x20] sm:$0xff]  ;;  %v259_v41 = vld [vmem:[#allocation6 + $0x30] sm:$0xff]  ;;  %v288_v26 = vshrl.u32 %v287_v25, 7 }
  0x40   :  { %361 = vmatprep.mubr.f32.mxu0 %v638_v1  ;;  %v513_v39 = vpack.c.bf16 %v260_v37, %v258_v36  ;;  %v262_v42 = vld [vmem:[#allocation6 + $0x48] sm:$0xff]  ;;  %v264_v43 = vld [vmem:[#allocation6 + $0x58] sm:$0xff]  ;;  %v515_v44 = vpack.c.bf16 %v259_v41, %v257_v40  ;;  %v261_v46 = vld [vmem:[#allocation6 + $0x40] sm:$0xff] }
  0x41   :  { %510 = vmatprep.subr.bf16.mxu0 %v509_v34  ;;  %v517_v45 = vpack.c.bf16 %v264_v43, %v262_v42  ;;  %v263_v47 = vld [vmem:[#allocation6 + $0x50] sm:$0xff]  ;;  %v266_v48 = vld [vmem:[#allocation6 + $0x68] sm:$0xff]  ;;  %v268_v49 = vld [vmem:[#allocation6 + $0x78] sm:$0xff] }
  0x42   :  { %493 = vmatpush3.bf16.msra.mxu1 %v492_v15  ;;  %512 = vmatpush1.bf16.msra.mxu0 %v511_v38  ;;  %v519_v50 = vpack.c.bf16 %v263_v47, %v261_v46  ;;  %v521_v51 = vpack.c.bf16 %v268_v49, %v266_v48  ;;  %v265_v52 = vld [vmem:[#allocation6 + $0x60] sm:$0xff]  ;;  %v267_v53 = vld [vmem:[#allocation6 + $0x70] sm:$0xff]  ;;  %v270_v54 = vld [vmem:[#allocation6 + $0x88] sm:$0xff] }
  0x43   :  { %494 = vmatprep.subr.bf16.mxu1 %v636_v0  ;;  %514 = vmatprep.subr.bf16.mxu0 %v513_v39  ;;  %v272_v55 = vld [vmem:[#allocation6 + $0x98] sm:$0xff]  ;;  %v523_v56 = vpack.c.bf16 %v267_v53, %v265_v52  ;;  %v269_v58 = vld [vmem:[#allocation6 + $0x80] sm:$0xff]  ;;  %v271_v59 = vld [vmem:[#allocation6 + $0x90] sm:$0xff]  ;;  %v293_v39 = vsub.s32 1, %v288_v26 }
  0x44   :  { %v525_v57 = vpack.c.bf16 %v272_v55, %v270_v54  ;;  %v274_v60 = vld [vmem:[#allocation6 + $0xa8] sm:$0xff]  ;;  %v276_v61 = vld [vmem:[#allocation6 + $0xb8] sm:$0xff]  ;;  %v527_v62 = vpack.c.bf16 %v271_v59, %v269_v58  ;;  %v275_v1 = vld [vmem:[#allocation6 + $0xb0] sm:$0xff] }
  0x45   :  { %v529_v63 = vpack.c.bf16 %v276_v61, %v274_v60  ;;  %v278_v2 = vld [vmem:[#allocation6 + $0xc8] sm:$0xff]  ;;  %v280_v3 = vld [vmem:[#allocation6 + $0xd8] sm:$0xff]  ;;  %v277_v6 = vld [vmem:[#allocation6 + $0xc0] sm:$0xff] }
  0x46   :  { %496 = vmatpush3.bf16.msra.mxu1 %v495_v18  ;;  %516 = vmatpush1.bf16.msra.mxu0 %v515_v44  ;;  %v533_v5 = vpack.c.bf16 %v280_v3, %v278_v2  ;;  %v279_v7 = vld [vmem:[#allocation6 + $0xd0] sm:$0xff]  ;;  %v411_v9 = vld [vmem:[%s747_s2] ss:$0 sm:$0xff]  ;;  %v284_v15 = vld [vmem:[#allocation6 + $0xf8] sm:$0xff] }
  0x47   :  { %497 = vmatprep.subr.bf16.mxu1 %v636_v0  ;;  %518 = vmatprep.subr.bf16.mxu0 %v517_v45  ;;  %v535_v8 = vpack.c.bf16 %v279_v7, %v277_v6  ;;  %v282_v14 = vld [vmem:[#allocation6 + $0xe8] sm:$0xff]  ;;  %v281_v17 = vld [vmem:[#allocation6 + $0xe0] sm:$0xff]  ;;  %v283_v18 = vld [vmem:[#allocation6 + $0xf0] sm:$0xff] }
  0x48   :  { %v537_v16 = vpack.c.bf16 %v284_v15, %v282_v14  ;;  %v539_v19 = vpack.c.bf16 %v283_v18, %v281_v17  ;;  %v414_v20 = vld [vmem:[%s749_s4] ss:$0 sm:$0xff] }
  0x49   :  { %v285_v28 = vld [vmem:[%s751_s6] sm:$0x3] }
  0x4a   :  { %499 = vmatpush3.bf16.msra.mxu1 %v498_v21  ;;  %520 = vmatpush1.bf16.msra.mxu0 %v519_v50  ;;  %v294_v42 = vrot.slane %v285_v28, %v293_v39 }
  0x4b   :  { %500 = vmatprep.subr.bf16.mxu1 %v636_v0  ;;  %522 = vmatprep.subr.bf16.mxu0 %v521_v51 }
  0x4e   :  { %502 = vmatpush3.bf16.msra.mxu1 %v501_v24  ;;  %524 = vmatpush1.bf16.msra.mxu0 %v523_v56  ;;  %v393_v56 = vand.u32 127, %v287_v25 }
  0x4f   :  { %503 = vmatprep.subr.bf16.mxu1 %v636_v0  ;;  %526 = vmatprep.subr.bf16.mxu0 %v525_v57 }
  0x50   :  { %vm394_vm4 = vcmp.lt.s32.totalorder %v393_v56, 6 }
  0x52   :  { %505 = vmatpush3.bf16.msra.mxu1 %v504_v27  ;;  %528 = vmatpush1.bf16.msra.mxu0 %v527_v62  ;;  %v289_v27 = vsub.s32 0, %v288_v26 }
  0x53   :  { %506 = vmatprep.subr.bf16.mxu1 %v636_v0  ;;  %v273_v0 = vld [vmem:[#allocation6 + $0xa0] sm:$0xff]  ;;  %530 = vmatprep.subr.bf16.mxu0 %v529_v63 }
  0x54   :  { %v531_v4 = vpack.c.bf16 %v275_v1, %v273_v0  ;;  %v290_v29 = vrot.slane %v285_v28, %v289_v27 }
  0x56   :  { %508 = vmatpush3.bf16.msra.mxu1 %v507_v30  ;;  %532 = vmatpush1.bf16.msra.mxu0 %v531_v4 }
  0x57   :  { %534 = vmatprep.subr.bf16.mxu0 %v533_v5 }
  0x5a   :  { %536 = vmatpush1.bf16.msra.mxu0 %v535_v8 }
  0x5b   :  { %538 = vmatprep.subr.bf16.mxu0 %v537_v16 }
  0x5e   :  { %540 = vmatpush1.bf16.msra.mxu0 %v539_v19 }
 0x112   :  { %v154_v10 = vpop.f32.mrb[0].mxu0 }
 0x113   :  { %v155_v11 = vadd.f32 %v411_v9, %v154_v10  ;;  %v446_v12 = vpop.f32.mrb[1].mxu0 }
 0x115   :  { %v158_v13 = vmax.f32 %v155_v11, 0.0 }
 0x117   :  { %480 = vmatmul.mubr.f32.vlgmr.msra.gmra.mrb[0].mxu1 %v158_v13 }
 0x1ea   :  { %v248_v21 = vpop.f32.mrb[0].mxu1 }
 0x1eb   :  { %v249_v22 = vadd.f32 %v414_v20, %v248_v21  ;;  %v481_v23 = vpop.f32.mrb[1].mxu1 }
 0x1ed   :  { %v252_v24 = vmax.f32 %v249_v22, 0.0 }
 0x1ef   :  { %362 = vmatmul.mubr.f32.vlgmr.msra.gmra.mrb[2].mxu0 %v252_v24 }
 0x2c2   :  { %v363_v30 = vpop.f32.mrb[2].mxu0 }
 0x2c3   :  { %v364_v31 = vadd.f32 %v363_v30, %v290_v29  ;;  %v365_v32 = vpop.f32.mrb[3].mxu0 }
 0x2c4   :  { %v366_v43 = vadd.f32 %v365_v32, %v294_v42 }
 0x2c5   :  { %v372_v33 = vmul.f32 -2.0, %v364_v31  ;;  %551 = vtanh.f32 %v364_v31  ;;  %v388_v53 = vsub.f32 0.6931472, %v364_v31 }
 0x2c6   :  { %v368_v45 = vmax.f32 %v366_v43, -20.0 }
 0x2c7   :  { %v374_v34 = vand.u32 2147483647, %v372_v33  ;;  %v373_v51 = vmax.f32 %v372_v33, 0.0 }
 0x2c8   :  { %v369_v49 = vmin.f32 %v368_v45, 2.0 }
 0x2c9   :  { %v375_v35 = vsub.f32 0.0, %v374_v34 }
 0x2ca   :  { %v370_v54 = vsub.f32 0.0, %v369_v49 }
 0x2cb   :  { %v376_v36 = vmul.f32 1.442695, %v375_v35 }
 0x2cc   :  { %v415_v58 = vadd.f32 -0.9189385, %v370_v54 }
 0x2cd   :  { %553 = vpow2.f32 %v376_v36 }
 0x2cf   :  { %v552_v37 = vpop.eup %551 }
 0x2d0   :  { %400 = vst [vmem:[%s752_s7] sm:$0xff] %v552_v37 }
 0x2d7   :  { %v554_v38 = vpop.eup %553 }
 0x2d8   :  { %v378_v40 = vadd.f32 1.0, %v554_v38 }
 0x2da   :  { %555 = vlog2.f32 %v378_v40  ;;  %v416_v41 = vadd.f32 -1.0, %v378_v40  ;;  %vm379_vm3 = vcmp.eq.f32.partialorder %v378_v40, 1.0 }
 0x2dc   :  { %557 = vrcp.f32 %v416_v41 }
 0x2e4   :  { %v556_v44 = vpop.eup %555 }
 0x2e5   :  { %v381_v47 = vmul.f32 0.6931472, %v556_v44 }
 0x2e6   :  { %v558_v46 = vpop.eup %557 }
 0x2e7   :  { %v384_v48 = vmul.f32 %v558_v46, %v554_v38 }
 0x2e9   :  { %v385_v50 = vmul.f32 %v384_v48, %v381_v47 }
 0x2eb   :  { %v386_v52 = vsel %vm379_vm3, %v554_v38, %v385_v50 }
 0x2ec   :  { %v387_v55 = vadd.f32 %v386_v52, %v373_v51 }
 0x2ee   :  { %v389_v57 = vsub.f32 %v388_v53, %v387_v55 }
 0x2f0   :  { %v390_v59 = vmul.f32 2.0, %v389_v57 }
 0x2f2   :  { %v391_v60 = vsub.f32 %v415_v58, %v390_v59 }
 0x2f4   :  { %v395_v61 = vsel %vm394_vm4, %v391_v60, 0.0 }
 0x2f5   :  { %396 = vadd.xlane.f32.xlu0 %v395_v61 }
 0x382   :  { %v397_v62 = vpop.xlane.xlu0 %396 }
 0x383   :  { %398 = vst [vmem:[%s753_s8] sm:$0xff] %v397_v62 }
 0x384   :  { %409 = vsyncpa [#allocation3], 1 }
 0x385   :  { %410 = vsyncpa [#allocation5], 1 }

</bundles_post_ra>
